<compile_context>
chip_gen: v7x
topology: tpu7x:2x2x1
jax: 0.10.0
libtpu: 0.0.40
codegen_flags: <defaults>
</compile_context>

<pallas_src>
import functools

import jax
import jax.numpy as jnp
from jax.experimental import pallas as pl
from jax.experimental.pallas import tpu as pltpu


def _pairre_kernel(idx_ref, ent_ref, rel_ref, o_ref, *, gamma):
    # idx_ref : VMEM (3, tb)  int32  -- rows = [head_idx, rel_idx, tail_idx]
    # ent_ref : VMEM (D, Ep)  f32    -- entity table, transposed + row-padded
    # rel_ref : VMEM (2D, Rp) f32    -- [rel_head ; rel_tail], transposed + padded
    # o_ref   : VMEM (1, tb)  f32    -- lane-dense scores
    D, Ep = ent_ref.shape
    Rp = rel_ref.shape[1]
    tb = o_ref.shape[1]
    eps2 = 1e-24  # (torch F.normalize eps=1e-12)**2; clamp on the squared norm

    hi = idx_ref[0:1, :]  # (1, tb)
    ri = idx_ref[1:2, :]  # (1, tb)
    ti = idx_ref[2:3, :]  # (1, tb)

    # --- Entity gather: one shared one-hot for head AND tail (item 5). -------
    # Batch stays on the 128-lane axis; rows selected by exact 0/1 weights.
    ht_idx = jnp.concatenate([hi, ti], axis=1)                        # (1, 2tb)
    ent_iota = jax.lax.broadcasted_iota(jnp.int32, (Ep, 2 * tb), 0)
    ent_onehot = (ent_iota == ht_idx).astype(jnp.float32)             # (Ep, 2tb)
    ht = jnp.dot(ent_ref[...], ent_onehot,
                 preferred_element_type=jnp.float32,
                 precision=jax.lax.Precision.HIGHEST)                 # (D, 2tb)
    h = ht[:, :tb]
    t = ht[:, tb:]

    # --- Relation gather: r_h and r_t fetched by a single matmul. -----------
    rel_iota = jax.lax.broadcasted_iota(jnp.int32, (Rp, tb), 0)
    rel_onehot = (rel_iota == ri).astype(jnp.float32)                 # (Rp, tb)
    r = jnp.dot(rel_ref[...], rel_onehot,
                preferred_element_type=jnp.float32,
                precision=jax.lax.Precision.HIGHEST)                  # (2D, tb)
    r_h = r[:D, :]
    r_t = r[D:, :]

    # L2-normalize along the feature (sublane) axis via EUP rsqrt:
    #   x * rsqrt(max(sum(x^2), eps^2)) == x / max(||x||_2, eps)
    inv_h = jax.lax.rsqrt(
        jnp.maximum(jnp.sum(h * h, axis=0, keepdims=True), eps2))
    inv_t = jax.lax.rsqrt(
        jnp.maximum(jnp.sum(t * t, axis=0, keepdims=True), eps2))

    diff = (h * inv_h) * r_h - (t * inv_t) * r_t                      # (D, tb)
    score = jnp.sum(jnp.abs(diff), axis=0, keepdims=True)             # (1, tb)
    o_ref[...] = gamma - score


def prepare_pairre_tables(entity_emb, rel_head_emb, rel_tail_emb):
    """One-time layout transform (item 8): features->sublanes, vocab->lanes,
    vocab padded to a multiple of 8 (item 6)."""
    E, D = entity_emb.shape
    R = rel_head_emb.shape[0]
    Ep = -(-E // 8) * 8
    Rp = -(-R // 8) * 8
    entity_t = jnp.pad(entity_emb.astype(jnp.float32),
                       ((0, Ep - E), (0, 0))).T                       # (D, Ep)
    rel = jnp.concatenate([rel_head_emb, rel_tail_emb],
                          axis=1).astype(jnp.float32)                 # (R, 2D)
    rel_t = jnp.pad(rel, ((0, Rp - R), (0, 0))).T                     # (2D, Rp)
    return entity_t, rel_t


def pairre_forward(sample, entity_t, rel_t, gamma):
    """sample: (B, 3) int triples [h, r, t]; entity_t/rel_t from
    prepare_pairre_tables(). Returns (B,) float32 scores."""
    D, Ep = entity_t.shape
    Rp = rel_t.shape[1]
    B = sample.shape[0]

    # --- Batch tiling (items 1 & 2): lanes per step <= 8192, and an even -----
    # --- number (>= 2) of "parallel" grid steps whenever B > 128. ------------
    TB_CAP = 8192
    chunks = pl.cdiv(B, 128)            # number of 128-lane chunks needed
    max_chunks = TB_CAP // 128
    if chunks <= 1:
        steps = 1
        tb = 128
    else:
        steps = 2
        while pl.cdiv(chunks, steps) > max_chunks:
            steps += 2
        tb = pl.cdiv(chunks, steps) * 128
    bp = steps * tb                      # zero-padded batch length

    # --- Merged index operand (item 4): one (3, bp) int32 array. -------------
    idx = sample.astype(jnp.int32).T                                   # (3, B)
    idx = jnp.pad(idx, ((0, 0), (0, bp - B)))                          # (3, bp)

    kernel = functools.partial(_pairre_kernel, gamma=float(gamma))     # item 7

    out = pl.pallas_call(
        kernel,
        out_shape=jax.ShapeDtypeStruct((1, bp), jnp.float32),
        grid=(steps,),
        in_specs=[
            pl.BlockSpec((3, tb), lambda i: (0, i)),        # merged h/r/t idx
            pl.BlockSpec((D, Ep), lambda i: (0, 0)),        # entity table^T
            pl.BlockSpec((2 * D, Rp), lambda i: (0, 0)),    # relation tables^T
        ],
        out_specs=pl.BlockSpec((1, tb), lambda i: (0, i)),  # lane-dense scores
        compiler_params=pltpu.CompilerParams(
            dimension_semantics=("parallel",),
            vmem_limit_bytes=32 * 1024 * 1024),
    )(idx, entity_t, rel_t)

    return out[0, :B]


def _xavier_uniform(key, shape, dtype=jnp.float32):
    fan_out, fan_in = shape  # nn.Embedding weight: (num_embeddings, dim)
    bound = (6.0 / (fan_in + fan_out)) ** 0.5
    return jax.random.uniform(key, shape, dtype, minval=-bound, maxval=bound)


def _reference(sample, entity_emb, rel_head_emb, rel_tail_emb, gamma):
    h = entity_emb[sample[:, 0]]
    rh = rel_head_emb[sample[:, 1]]
    rt = rel_tail_emb[sample[:, 1]]
    t = entity_emb[sample[:, 2]]
    eps = 1e-12
    h = h / jnp.maximum(jnp.linalg.norm(h, axis=-1, keepdims=True), eps)
    t = t / jnp.maximum(jnp.linalg.norm(t, axis=-1, keepdims=True), eps)
    score = jnp.sum(jnp.abs(h * rh - t * rt), axis=-1)
    return gamma - score


if __name__ == "__main__":
    entity_dict_len = 50
    relation_dict_len = 20
    embedding_dim = 32
    gamma = 6.0

    key = jax.random.PRNGKey(0)
    k_e, k_rh, k_rt, k_s = jax.random.split(key, 4)

    entity_emb = _xavier_uniform(k_e, (entity_dict_len, embedding_dim))
    rel_head_emb = _xavier_uniform(k_rh, (relation_dict_len, embedding_dim))
    rel_tail_emb = _xavier_uniform(k_rt, (relation_dict_len, embedding_dim))

    # Table layout transform hoisted out of the per-call path (item 8).
    entity_t, rel_t = prepare_pairre_tables(entity_emb, rel_head_emb,
                                            rel_tail_emb)
    entity_t = jax.block_until_ready(entity_t)
    rel_t = jax.block_until_ready(rel_t)

    def make_sample(k, batch):
        heads = jax.random.randint(k, (batch,), 0, entity_dict_len)
        rels = jax.random.randint(jax.random.fold_in(k, 1), (batch,), 0,
                                  relation_dict_len)
        tails = jax.random.randint(jax.random.fold_in(k, 2), (batch,), 0,
                                   entity_dict_len)
        return jnp.stack([heads, rels, tails], axis=1).astype(jnp.int32)

    # Case 1: tiny batch (single 128-lane grid step, zero-padded).
    sample_small = make_sample(k_s, 8)
    out_small = jax.block_until_ready(
        pairre_forward(sample_small, entity_t, rel_t, gamma))
    ref_small = _reference(sample_small, entity_emb, rel_head_emb,
                           rel_tail_emb, gamma)
    assert out_small.shape == (8,)
    assert jnp.allclose(out_small, ref_small, atol=1e-4, rtol=1e-4), (
        out_small, ref_small)

    # Case 2: batch exercising the even 2-step grid + zero-padded tail path.
    sample_big = make_sample(jax.random.fold_in(k_s, 7), 300)
    out_big = jax.block_until_ready(
        pairre_forward(sample_big, entity_t, rel_t, gamma))
    ref_big = _reference(sample_big, entity_emb, rel_head_emb, rel_tail_emb,
                         gamma)
    assert out_big.shape == (300,)
    assert jnp.allclose(out_big, ref_big, atol=1e-4, rtol=1e-4), (
        out_big, ref_big)

    print("KERNEL_OK")
</pallas_src>

<mosaic_0001>
module attributes {stable_mosaic.version = 11 : i64} {
  func.func @_pairre_kernel(%arg0: i32, %arg1: memref<3x128xi32, #tpu.memory_space<vmem>>, %arg2: memref<32x56xf32, #tpu.memory_space<vmem>>, %arg3: memref<64x24xf32, #tpu.memory_space<vmem>>, %arg4: memref<1x128xf32, #tpu.memory_space<vmem>>) attributes {dimension_semantics = [#tpu.dimension_semantics<parallel>], iteration_bounds = array<i64: 1>, scalar_prefetch = 0 : i64, scratch_operands = 0 : i64, tpu.core_type = #tpu.core_type<tc>, window_params = [{transform_indices = @transform_0, window_bounds = array<i64: 3, 128>}, {pipeline_mode = #tpu.pipeline_mode<synchronous>, transform_indices = @transform_1, window_bounds = array<i64: 32, 56>}, {pipeline_mode = #tpu.pipeline_mode<synchronous>, transform_indices = @transform_2, window_bounds = array<i64: 64, 24>}, {transform_indices = @transform_3, window_bounds = array<i64: 1, 128>}]} {
    %c0 = arith.constant 0 : index
    %c0_0 = arith.constant 0 : index
    %0 = vector.load %arg1[%c0, %c0_0] : memref<3x128xi32, #tpu.memory_space<vmem>>, vector<1x128xi32>
    %c1 = arith.constant 1 : index
    %c0_1 = arith.constant 0 : index
    %1 = vector.load %arg1[%c1, %c0_1] : memref<3x128xi32, #tpu.memory_space<vmem>>, vector<1x128xi32>
    %c2 = arith.constant 2 : index
    %c0_2 = arith.constant 0 : index
    %2 = vector.load %arg1[%c2, %c0_2] : memref<3x128xi32, #tpu.memory_space<vmem>>, vector<1x128xi32>
    %3 = tpu.concatenate %0, %2 in 1 : vector<1x128xi32>, vector<1x128xi32> -> vector<1x256xi32>
    %4 = tpu.iota {dimensions = array<i32: 0>} : vector<56x256xi32>
    %5 = vector.broadcast %3 : vector<1x256xi32> to vector<56x256xi32>
    %6 = arith.cmpi eq, %4, %5 : vector<56x256xi32>
    %7 = arith.extui %6 : vector<56x256xi1> to vector<56x256xi32>
    %8 = arith.sitofp %7 : vector<56x256xi32> to vector<56x256xf32>
    %c0_3 = arith.constant 0 : index
    %c0_4 = arith.constant 0 : index
    %9 = vector.load %arg2[%c0_3, %c0_4] : memref<32x56xf32, #tpu.memory_space<vmem>>, vector<32x56xf32>
    %cst = arith.constant dense<0.000000e+00> : vector<32x256xf32>
    %10 = tpu.matmul %9, %8, %cst {dimension_numbers = #tpu.dot_dimension_numbers<[1], [0], [0], [1], [0, 0, 1, 1], [], []>, precision = #tpu.contract_precision<fp32>} : vector<32x56xf32>, vector<56x256xf32>, vector<32x256xf32> -> vector<32x256xf32>
    %11 = vector.extract_strided_slice %10 {offsets = [0, 0], sizes = [32, 128], strides = [1, 1]} : vector<32x256xf32> to vector<32x128xf32>
    %12 = vector.extract_strided_slice %10 {offsets = [0, 128], sizes = [32, 128], strides = [1, 1]} : vector<32x256xf32> to vector<32x128xf32>
    %13 = tpu.iota {dimensions = array<i32: 0>} : vector<24x128xi32>
    %14 = vector.broadcast %1 : vector<1x128xi32> to vector<24x128xi32>
    %15 = arith.cmpi eq, %13, %14 : vector<24x128xi32>
    %16 = arith.extui %15 : vector<24x128xi1> to vector<24x128xi32>
    %17 = arith.sitofp %16 : vector<24x128xi32> to vector<24x128xf32>
    %c0_5 = arith.constant 0 : index
    %c0_6 = arith.constant 0 : index
    %18 = vector.load %arg3[%c0_5, %c0_6] : memref<64x24xf32, #tpu.memory_space<vmem>>, vector<64x24xf32>
    %cst_7 = arith.constant dense<0.000000e+00> : vector<64x128xf32>
    %19 = tpu.matmul %18, %17, %cst_7 {dimension_numbers = #tpu.dot_dimension_numbers<[1], [0], [0], [1], [0, 0, 1, 1], [], []>, precision = #tpu.contract_precision<fp32>} : vector<64x24xf32>, vector<24x128xf32>, vector<64x128xf32> -> vector<64x128xf32>
    %20 = vector.extract_strided_slice %19 {offsets = [0, 0], sizes = [32, 128], strides = [1, 1]} : vector<64x128xf32> to vector<32x128xf32>
    %21 = vector.extract_strided_slice %19 {offsets = [32, 0], sizes = [32, 128], strides = [1, 1]} : vector<64x128xf32> to vector<32x128xf32>
    %22 = arith.mulf %11, %11 : vector<32x128xf32>
    %cst_8 = arith.constant dense<0.000000e+00> : vector<128xf32>
    %23 = vector.multi_reduction <add>, %22, %cst_8 [0] : vector<32x128xf32> to vector<128xf32>
    %24 = vector.shape_cast %23 : vector<128xf32> to vector<1x128xf32>
    %cst_9 = arith.constant 1.000000e-24 : f32
    %25 = vector.broadcast %cst_9 : f32 to vector<1x128xf32>
    %26 = arith.maximumf %24, %25 : vector<1x128xf32>
    %27 = math.rsqrt %26 : vector<1x128xf32>
    %28 = arith.mulf %12, %12 : vector<32x128xf32>
    %cst_10 = arith.constant dense<0.000000e+00> : vector<128xf32>
    %29 = vector.multi_reduction <add>, %28, %cst_10 [0] : vector<32x128xf32> to vector<128xf32>
    %30 = vector.shape_cast %29 : vector<128xf32> to vector<1x128xf32>
    %cst_11 = arith.constant 1.000000e-24 : f32
    %31 = vector.broadcast %cst_11 : f32 to vector<1x128xf32>
    %32 = arith.maximumf %30, %31 : vector<1x128xf32>
    %33 = math.rsqrt %32 : vector<1x128xf32>
    %34 = vector.broadcast %27 : vector<1x128xf32> to vector<32x128xf32>
    %35 = arith.mulf %11, %34 : vector<32x128xf32>
    %36 = arith.mulf %35, %20 : vector<32x128xf32>
    %37 = vector.broadcast %33 : vector<1x128xf32> to vector<32x128xf32>
    %38 = arith.mulf %12, %37 : vector<32x128xf32>
    %39 = arith.mulf %38, %21 : vector<32x128xf32>
    %40 = arith.subf %36, %39 : vector<32x128xf32>
    %41 = math.absf %40 : vector<32x128xf32>
    %cst_12 = arith.constant dense<0.000000e+00> : vector<128xf32>
    %42 = vector.multi_reduction <add>, %41, %cst_12 [0] : vector<32x128xf32> to vector<128xf32>
    %43 = vector.shape_cast %42 : vector<128xf32> to vector<1x128xf32>
    %cst_13 = arith.constant 6.000000e+00 : f32
    %44 = vector.broadcast %cst_13 : f32 to vector<1x128xf32>
    %45 = arith.subf %44, %43 : vector<1x128xf32>
    %c0_14 = arith.constant 0 : index
    %c0_15 = arith.constant 0 : index
    %46 = vector.load %arg4[%c0_14, %c0_15] : memref<1x128xf32, #tpu.memory_space<vmem>>, vector<1x128xf32>
    tpu.vector_store %arg4[%c0_14, %c0_15], %45 {strides = array<i32>} : memref<1x128xf32, #tpu.memory_space<vmem>>, vector<1x128xf32>,
    return
  }
  func.func @transform_0(%arg0: i32) -> (i32, i32) {
    %c0_i32 = arith.constant 0 : i32
    %c0_i32_0 = arith.constant 0 : i32
    return %c0_i32, %arg0 : i32, i32
  }
  func.func @transform_1(%arg0: i32) -> (i32, i32) {
    %c0_i32 = arith.constant 0 : i32
    %c0_i32_0 = arith.constant 0 : i32
    %c0_i32_1 = arith.constant 0 : i32
    return %c0_i32, %c0_i32_0 : i32, i32
  }
  func.func @transform_2(%arg0: i32) -> (i32, i32) {
    %c0_i32 = arith.constant 0 : i32
    %c0_i32_0 = arith.constant 0 : i32
    %c0_i32_1 = arith.constant 0 : i32
    return %c0_i32, %c0_i32_0 : i32, i32
  }
  func.func @transform_3(%arg0: i32) -> (i32, i32) {
    %c0_i32 = arith.constant 0 : i32
    %c0_i32_0 = arith.constant 0 : i32
    return %c0_i32, %arg0 : i32, i32
  }
}

</mosaic_0001>

<bundles_post_ra>
// kernel: tpu_custom_call.1
= control target key start
LH: loop header
LB: loop body
LE: loop exit
PB: predicated region body
PF: predicated region fallthrough
CT: control target
= control target key end

     0   :  { %v18_v1 = vlaneseq  ;;  %vm882_vm0 = vcmask 195584   ;;  %v2920_v5 = vmov 0.0   ;;  %s2900_s0 = inlined_call_operand.vmem [shape: s32[3,128], index: 0, kind: input, shape index: {}]   ;;  %s2901_s1 = inlined_call_operand.vmem [shape: f32[32,56], index: 1, kind: input, shape index: {}]   ;;  %s2902_s2 = inlined_call_operand.vmem [shape: f32[64,24], index: 2, kind: input, shape index: {}]   ;;  %s2903_s3 = inlined_call_operand.hbm [shape: f32[1,128], index: 3, kind: output, shape index: {}]  }
   0x1   :  { %v2239_v0 = vld [vmem:[%s2900_s0 + $0x2] ss:$0 sm:$0xff]  ;;  %v1817_v2 = vld [vmem:[%s2900_s0 + $0x1] ss:$0 sm:$0xff]  ;;  %v2247_v3 = vld [vmem:[%s2900_s0] ss:$0 sm:$0xff]  ;;  %171 = vmatprep.mubr.f32.mxu0 %v2920_v5 }
   0x2   :  { %2944 = vst [vmem:[#allocation5_spill] sm:$0xff] %v2239_v0  ;;  %2945 = vst [vmem:[#allocation6_spill] sm:$0xff] %v2247_v3  ;;  %v874_v4 = vld [vmem:[%s2902_s2] sm:$0xff]  ;;  %v2253_v6 = vshrl.u32 %v18_v1, 7  ;;  %v875_v8 = vld [vmem:[%s2902_s2 + $0x8] sm:$0xff] }
   0x3   :  { %v884_v7 = vsel %vm882_vm0, %v874_v4, 0  ;;  %v876_v9 = vld [vmem:[%s2902_s2 + $0x10] sm:$0xff]  ;;  %v877_v10 = vld [vmem:[%s2902_s2 + $0x18] sm:$0xff]  ;;  %v2268_v12 = vsel %vm882_vm0, %v875_v8, 0 }
   0x4   :  { %v2265_v11 = vand.u32 4294901760, %v884_v7  ;;  %v2271_v13 = vsel %vm882_vm0, %v876_v9, 0  ;;  %v2274_v14 = vsel %vm882_vm0, %v877_v10, 0  ;;  %v20_v15 = vadd.s32 8, %v2253_v6 }
   0x5   :  { %vm35_vm1 = vcmp.eq.s32.totalorder %v2253_v6, %v2239_v0  ;;  %vm865_vm2 = vcmp.eq.s32.totalorder %v2253_v6, %v1817_v2  ;;  %vm34_vm3 = vcmp.eq.s32.totalorder %v2253_v6, %v2247_v3  ;;  %v21_v19 = vadd.s32 16, %v2253_v6 }
   0x6   :  { %v1762_v16 = vsel %vm35_vm1, 1.0, %v2920_v5  ;;  %v1818_v17 = vsel %vm865_vm2, 1.0, %v2920_v5  ;;  %v1761_v18 = vsel %vm34_vm3, 1.0, %v2920_v5  ;;  %vm37_vm4 = vcmp.eq.s32.totalorder %v20_v15, %v2239_v0 }
   0x7   :  { %v2292_v20 = vsub.f32 %v1762_v16, %v1762_v16  ;;  %vm866_vm5 = vcmp.eq.s32.totalorder %v20_v15, %v1817_v2  ;;  %v2294_v21 = vsub.f32 %v1818_v17, %v1818_v17 }
   0x8   :  { %8 = vsyncpa [#allocation3], 0  ;;  %v1764_v22 = vsel %vm37_vm4, 1.0, %v2920_v5  ;;  %v1819_v24 = vsel %vm866_vm5, 1.0, %v2920_v5  ;;  %vm36_vm7 = vcmp.eq.s32.totalorder %v20_v15, %v2247_v3  ;;  %v2303_v25 = vsub.f32 %v1761_v18, %v1761_v18  ;;  %v878_v10 = vld [vmem:[%s2902_s2 + $0x20] sm:$0xff] }
   0x9   :  { %vm2297_vm6 = vmpackc.low %vm37_vm4, %vm35_vm1  ;;  %v2916_v26 = vmov 1.0|1.0   ;;  %v2308_v27 = vsub.f32 %v1764_v22, %v1764_v22  ;;  %v2316_v29 = vsub.f32 %v1819_v24, %v1819_v24  ;;  %v1763_v30 = vsel %vm36_vm7, 1.0, %v2920_v5 }
   0xa   :  { %2005 = vmatprep.subr.msk.bf16.mxu0 %vm2297_vm6, %v2916_v26  ;;  %vm2312_vm8 = vmpackc.low %vm866_vm5, %vm865_vm2  ;;  %v22_v31 = vadd.s32 24, %v2253_v6  ;;  %v2905_v33 = vand.u32 4294901760, %v2303_v25  ;;  %v2331_v34 = vsub.f32 %v1763_v30, %v1763_v30  ;;  %vm39_vm10 = vcmp.eq.s32.totalorder %v21_v19, %v2239_v0 }
   0xb   :  { %2077 = vmatprep.subr.msk.bf16.mxu1 %vm2312_vm8, %v2916_v26  ;;  %vm2326_vm9 = vmpackc.low %vm36_vm7, %vm34_vm3  ;;  %vm2334_vm11 = vcmp.eq.s32.totalorder %v21_v19, %v1817_v2  ;;  %v1766_v36 = vsel %vm39_vm10, 1.0, %v2920_v5  ;;  %vm38_vm13 = vcmp.eq.s32.totalorder %v21_v19, %v2247_v3  ;;  %vm80_vm15 = vcmask 457728  }
   0xc   :  { %2007 = vmatpush1.bf16.msk.msra.mxu0 %vm2326_vm9, %v2916_v26  ;;  %2079 = vmatpush3.bf16.msk.msra.mxu1 %vm2312_vm8, %v2916_v26  ;;  %vm41_vm12 = vcmp.eq.s32.totalorder %v22_v31, %v2239_v0  ;;  %vm40_vm14 = vcmp.eq.s32.totalorder %v22_v31, %v2247_v3  ;;  %v2351_v37 = vsub.f32 %v2303_v25, %v2905_v33  ;;  %v2904_v38 = vand.u32 4294901760, %v2331_v34 }
   0xd   :  { %v1768_v39 = vsel %vm41_vm12, 1.0, %v2920_v5  ;;  %vm2355_vm1 = vmpackc.low %vm41_vm12, %vm39_vm10  ;;  %v2359_v41 = vsub.f32 %v1766_v36, %v1766_v36  ;;  %v2912_v42 = vmov 1.0   ;;  %v1765_v44 = vsel %vm38_vm13, 1.0, %v2920_v5 }
   0xe   :  { %1900 = vmatprep.subr.msk.mxu1 %vm2334_vm11, %v2912_v42  ;;  %2009 = vmatprep.subr.msk.bf16.mxu0 %vm2355_vm1, %v2916_v26  ;;  %v2367_v43 = vsub.f32 %v1768_v39, %v1768_v39  ;;  %v1767_v45 = vsel %vm40_vm14, 1.0, %v2920_v5  ;;  %vm2371_vm2 = vmpackc.low %vm40_vm14, %vm38_vm13  ;;  %v2956_v46 = vmov 0  ;;  %v2376_v47 = vsub.f32 %v884_v7, %v2265_v11 }
   0xf   :  { %v2957_v46 = vsel %vm2371_vm2, 4294967295, %v2956_v46  ;;  %v226_v48 = vand.u32 4294901760, %v2351_v37  ;;  %v2382_v49 = vsub.f32 %v2331_v34, %v2904_v38  ;;  %v2384_v50 = vsub.f32 %v1765_v44, %v1765_v44 }
  0x10   :  { %2958 = vst [vmem:[#allocation7_spill] sm:$0xff] %v2957_v46  ;;  %v2386_v51 = vsub.f32 %v1767_v45, %v1767_v45  ;;  %2011 = vmatpush1.bf16.msk.msra.mxu0 %vm2371_vm2, %v2916_v26  ;;  %1901 = vmatpush3.msk.msra.mxu1 %vm2334_vm11, %v2912_v42  ;;  %v2911_v52 = vand.u32 4294901760, %v2376_v47  ;;  %v2396_v53 = vand.u32 4294901760, %v2268_v12  ;;  %v23_v54 = vadd.s32 32, %v2253_v6 }
  0x11   :  { %v24_v55 = vadd.s32 40, %v2253_v6  ;;  %v238_v56 = vand.u32 4294901760, %v2382_v49  ;;  %v2922_v57 = vand.u32 4294901760, %v2384_v50  ;;  %v2404_v59 = vand.u32 4294901760, %v2271_v13 }
  0x12   :  { %v978_v60 = vsub.f32 %v2376_v47, %v2911_v52  ;;  %v2411_v61 = vsub.f32 %v2268_v12, %v2396_v53  ;;  %vm43_vm3 = vcmp.eq.s32.totalorder %v23_v54, %v2239_v0  ;;  %v2959_v1 = vmov 0  ;;  %v76_v12 = vld [vmem:[%s2901_s1] sm:$0xff] }
  0x13   :  { %vm45_vm4 = vcmp.eq.s32.totalorder %v24_v55, %v2239_v0  ;;  %v1770_v62 = vsel %vm43_vm3, 1.0, %v2920_v5  ;;  %vm42_vm7 = vcmp.eq.s32.totalorder %v23_v54, %v2247_v3  ;;  %vm44_vm10 = vcmp.eq.s32.totalorder %v24_v55, %v2247_v3 }
  0x14   :  { %v1772_v63 = vsel %vm45_vm4, 1.0, %v2920_v5  ;;  %vm2417_vm5 = vmpackc.low %vm45_vm4, %vm43_vm3  ;;  %v979_v2 = vand.u32 4294901760, %v978_v60  ;;  %v2909_v4 = vand.u32 4294901760, %v2411_v61  ;;  %v2427_v7 = vsub.f32 %v1770_v62, %v1770_v62  ;;  %v879_v60 = vld [vmem:[%s2902_s2 + $0x28] sm:$0xff] }
  0x15   :  { %v2960_v1 = vsel %vm2417_vm5, 4294967295, %v2959_v1  ;;  %2013 = vmatprep.subr.msk.bf16.mxu0 %vm2417_vm5, %v2916_v26  ;;  %v2429_v8 = vsub.f32 %v1772_v63, %v1772_v63  ;;  %vm2431_vm12 = vmpackc.low %vm44_vm10, %vm42_vm7  ;;  %v2962_v9 = vmov 0  ;;  %v1769_v15 = vsel %vm42_vm7, 1.0, %v2920_v5 }
  0x16   :  { %2961 = vst [vmem:[#allocation8_spill] sm:$0xff] %v2960_v1  ;;  %v2963_v9 = vsel %vm2431_vm12, 4294967295, %v2962_v9  ;;  %v1771_v16 = vsel %vm44_vm10, 1.0, %v2920_v5  ;;  %2015 = vmatpush1.bf16.msk.msra.mxu0 %vm2431_vm12, %v2916_v26  ;;  %v2448_v17 = vsub.f32 %v2271_v13, %v2404_v59  ;;  %v2451_v18 = vand.u32 4294901760, %v2274_v14  ;;  %1902 = vmatprep.mubr.f32.mxu1 %v979_v2 }
  0x17   :  { %2964 = vst [vmem:[#allocation9_spill] sm:$0xff] %v2963_v9  ;;  %v988_v19 = vsub.f32 %v2411_v61, %v2909_v4  ;;  %v2456_v22 = vsub.f32 %v1769_v15, %v1769_v15  ;;  %v2458_v24 = vsub.f32 %v1771_v16, %v1771_v16  ;;  %v2461_v30 = vadd.s32 48, %v2253_v6 }
  0x18   :  { %v2907_v31 = vand.u32 4294901760, %v2448_v17  ;;  %v2466_v13 = vsub.f32 %v2274_v14, %v2451_v18  ;;  %v896_v36 = vsel %vm882_vm0, %v878_v10, 0  ;;  %v82_v39 = vsel %vm80_vm15, %v76_v12, 0 }
  0x19   :  { %2965 = vst [vmem:[#allocation10_spill] sm:$0xff] %v2461_v30  ;;  %v989_v44 = vand.u32 4294901760, %v988_v19  ;;  %vm47_vm13 = vcmp.eq.s32.totalorder %v2461_v30, %v2239_v0  ;;  %vm46_vm14 = vcmp.eq.s32.totalorder %v2461_v30, %v2247_v3  ;;  %v2501_v2 = vand.u32 4294901760, %v896_v36 }
  0x1a   :  { %v998_v6 = vsub.f32 %v2448_v17, %v2907_v31  ;;  %v2906_v55 = vand.u32 4294901760, %v2466_v13  ;;  %v1774_v14 = vsel %vm47_vm13, 1.0, %v2920_v5  ;;  %1787 = vmatprep.subr.msk.mxu0 %vm47_vm13, %v2912_v42  ;;  %v1773_v63 = vsel %vm46_vm14, 1.0, %v2920_v5 }
  0x1b   :  { %1903 = vmatmul.mubr.f32.vlgmr.msra.gmra.mrb[0].mxu1 %v989_v44  ;;  %v2491_v62 = vsub.f32 %v1774_v14, %v1774_v14  ;;  %1788 = vmatpush1.msk.msra.mxu0 %vm46_vm14, %v2912_v42  ;;  %v2503_v10 = vand.u32 4294901760, %v82_v39  ;;  %v2508_v16 = vsub.f32 %v1773_v63, %v1773_v63  ;;  %v2908_v19 = vand.u32 4294901760, %v2292_v20 }
  0x1c   :  { %v999_v12 = vand.u32 4294901760, %v998_v6  ;;  %v1008_v15 = vsub.f32 %v2466_v13, %v2906_v55  ;;  %v2512_v44 = vsub.f32 %v896_v36, %v2501_v2  ;;  %v2910_v38 = vand.u32 4294901760, %v2308_v27  ;;  %v880_v6 = vld [vmem:[%s2902_s2 + $0x30] sm:$0xff] }
  0x1d   :  { %v2515_v14 = vsub.f32 %v82_v39, %v2503_v10  ;;  %v899_v33 = vsel %vm882_vm0, %v879_v60, 0  ;;  %v219_v63 = vsub.f32 %v2292_v20, %v2908_v19  ;;  %v2018_v36 = vpack.c.bf16 %v238_v56, %v226_v48  ;;  %v77_v19 = vld [vmem:[%s2901_s1 + $0x8] sm:$0xff] }
  0x1e   :  { %1905 = vmatprep.mubr.f32.mxu1 %v999_v12  ;;  %v1009_v55 = vand.u32 4294901760, %v1008_v15  ;;  %v2525_v31 = vand.u32 4294901760, %v899_v33  ;;  %v2914_v39 = vand.u32 4294901760, %v2512_v44  ;;  %v231_v12 = vsub.f32 %v2308_v27, %v2910_v38 }
  0x1f   :  { %v2915_v60 = vand.u32 4294901760, %v2515_v14  ;;  %v2918_v15 = vand.u32 4294901760, %v2294_v21  ;;  %v220_v4 = vand.u32 4294901760, %v219_v63  ;;  %v2919_v48 = vand.u32 4294901760, %v2316_v29 }
  0x20   :  { %1906 = vmatmul.mubr.f32.gmra.mrb[2].mxu1 %v1009_v55  ;;  %v2541_v37 = vsub.f32 %v899_v33, %v2525_v31  ;;  %v902_v49 = vsel %vm882_vm0, %v880_v6, 0  ;;  %v1018_v56 = vsub.f32 %v2512_v44, %v2914_v39  ;;  %v232_v52 = vand.u32 4294901760, %v231_v12  ;;  %v881_v39 = vld [vmem:[%s2902_s2 + $0x38] sm:$0xff] }
  0x21   :  { %v175_v38 = vsub.f32 %v2515_v14, %v2915_v60  ;;  %v1059_v55 = vsub.f32 %v2294_v21, %v2918_v15  ;;  %v1066_v63 = vsub.f32 %v2316_v29, %v2919_v48  ;;  %v2558_v6 = vand.u32 4294901760, %v902_v49 }
  0x22   :  { %v2923_v33 = vand.u32 4294901760, %v2541_v37  ;;  %v85_v42 = vsel %vm80_vm15, %v77_v19, 0  ;;  %v1019_v60 = vand.u32 4294901760, %v1018_v56  ;;  %v2016_v26 = vpack.c.bf16 %v232_v52, %v220_v4 }
  0x23   :  { %v176_v12 = vand.u32 4294901760, %v175_v38  ;;  %v1060_v54 = vand.u32 4294901760, %v1059_v55  ;;  %v1067_v45 = vand.u32 4294901760, %v1066_v63  ;;  %v2568_v58 = vsub.f32 %v902_v49, %v2558_v6 }
  0x24   :  { %v1028_v15 = vsub.f32 %v2541_v37, %v2923_v33  ;;  %v2570_v48 = vand.u32 4294901760, %v85_v42  ;;  %1908 = vmatprep.mubr.f32.mxu1 %v1019_v60  ;;  %v2925_v19 = vand.u32 4294901760, %v2359_v41  ;;  %v2924_v5 = vand.u32 4294901760, %v2367_v43  ;;  %2017 = vmatprep.subr.bf16.mxu0 %v2016_v26 }
  0x25   :  { %177 = vmatmul.mubr.f32.vlgmr.msra.gmra.mrb[0].mxu0 %v176_v12  ;;  %v905_v38 = vsel %vm882_vm0, %v881_v39, 0  ;;  %v249_v52 = vsub.f32 %v2384_v50, %v2922_v57  ;;  %v2080_v56 = vpack.c.bf16 %v1067_v45, %v1060_v54  ;;  %v2966_v55 = vmov 0.0   ;;  %v78_v45 = vld [vmem:[%s2901_s1 + $0x10] sm:$0xff] }
  0x26   :  { %v1029_v4 = vand.u32 4294901760, %v1028_v15  ;;  %182 = vmatprep.mubr.f32.mxu0 %v2966_v55  ;;  %v2926_v49 = vand.u32 4294901760, %v2568_v58  ;;  %v2581_v60 = vsub.f32 %v85_v42, %v2570_v48  ;;  %2019 = vmatpush1.bf16.msra.mxu0 %v2018_v36  ;;  %v243_v63 = vsub.f32 %v2359_v41, %v2925_v19 }
  0x27   :  { %v255_v39 = vsub.f32 %v2367_v43, %v2924_v5  ;;  %v2589_v12 = vand.u32 4294901760, %v905_v38  ;;  %v250_v26 = vand.u32 4294901760, %v249_v52  ;;  %2081 = vmatprep.subr.bf16.mxu1 %v2080_v56  ;;  %v2967_v36 = vand.u32 4294901760, %v2386_v51 }
  0x28   :  { %1909 = vmatmul.mubr.f32.gmra.mrb[4].mxu1 %v1029_v4  ;;  %v1038_v42 = vsub.f32 %v2568_v58, %v2926_v49  ;;  %v2933_v54 = vand.u32 4294901760, %v2581_v60  ;;  %v1820_v52 = vsel %vm2334_vm11, 1.0, %v2966_v55  ;;  %v244_v57 = vand.u32 4294901760, %v243_v63 }
  0x29   :  { %v261_v15 = vsub.f32 %v2386_v51, %v2967_v36  ;;  %2083 = vmatpush3.bf16.msra.mxu1 %v2080_v56  ;;  %v256_v33 = vand.u32 4294901760, %v255_v39  ;;  %v2605_v4 = vsub.f32 %v905_v38, %v2589_v12  ;;  %v2607_v5 = vsub.f32 %v1820_v52, %v1820_v52  ;;  %v79_v38 = vld [vmem:[%s2901_s1 + $0x18] sm:$0xff]  ;;  %s2215_s1 = smov [#allocation2]  }
  0x2a   :  { %v1039_v19 = vand.u32 4294901760, %v1038_v42  ;;  %v186_v49 = vsub.f32 %v2581_v60, %v2933_v54  ;;  %v88_v36 = vsel %vm80_vm15, %v78_v45, 0  ;;  %v2939_v52 = vand.u32 4294901760, %v2427_v7  ;;  %s1751_s13 = sshll.u32 %s2215_s1, 4  ;;  %s1752_s13 = int_to_ptr.vmem [resolvable:$true] %s1751_s13 }
  0x2b   :  { %v262_v3 = vand.u32 4294901760, %v261_v15  ;;  %v2020_v0 = vpack.c.bf16 %v256_v33, %v244_v57  ;;  %v2934_v30 = vand.u32 4294901760, %v2605_v4  ;;  %v2615_v56 = vand.u32 4294901760, %v2607_v5  ;;  %s2188_s14 = scalar_lea.vmem %s1752_s13, 16  ;;  %s2192_s15 = scalar_lea.vmem %s1752_s13, 32 }
  0x2c   :  { %v2617_v63 = vand.u32 4294901760, %v88_v36  ;;  %1911 = vmatprep.mubr.f32.mxu1 %v1039_v19  ;;  %v187_v39 = vand.u32 4294901760, %v186_v49  ;;  %v278_v15 = vand.u32 4294901760, %v2429_v8  ;;  %v2969_v54 = vand.u32 4294901760, %v2456_v22  ;;  %p2189_p0 = scmp.ne.s32.totalorder %s1752_s13, %s2188_s14  ;;  %p2193_p1 = scmp.lt.s32.totalorder %s1752_s13, %s1752_s13 }
  0x2d   :  { %2968 = vst [vmem:[#allocation11_spill] sm:$0xff] %v2615_v56  ;;  %v2022_v42 = vpack.c.bf16 %v262_v3, %v250_v26  ;;  %2021 = vmatprep.subr.bf16.mxu0 %v2020_v0  ;;  %v1048_v57 = vsub.f32 %v2605_v4, %v2934_v30  ;;  %v1073_v33 = vsub.f32 %v2607_v5, %v2615_v56  ;;  %v2970_v49 = vand.u32 4294901760, %v2458_v24  ;;  %p2194_p2 = scmp.lt.s32.totalorder %s2192_s15, %s2188_s14 }
  0x2e   :  { %v2630_v45 = vsub.f32 %v88_v36, %v2617_v63  ;;  %v273_v19 = vsub.f32 %v2456_v22, %v2969_v54  ;;  %188 = vmatmul.mubr.f32.gmra.mrb[2].mxu0 %v187_v39  ;;  %v267_v3 = vsub.f32 %v2427_v7, %v2939_v52  ;;  %v279_v0 = vsub.f32 %v2429_v8, %v278_v15 }
  0x2f   :  { %v285_v26 = vsub.f32 %v2458_v24, %v2970_v49  ;;  %v91_v36 = vsel %vm80_vm15, %v79_v38, 0  ;;  %v1049_v30 = vand.u32 4294901760, %v1048_v57  ;;  %2023 = vmatpush1.bf16.msra.mxu0 %v2022_v42  ;;  %v1074_v56 = vand.u32 4294901760, %v1073_v33  ;;  %193 = vmatprep.mubr.f32.mxu0 %v2966_v55  ;;  %p2195_p3 = por %p2194_p2, %p2193_p1 }
  0x30   :  { %v196_v54 = vand.u32 4294901760, %v2630_v45  ;;  %v274_v39 = vand.u32 4294901760, %v273_v19  ;;  %v268_v9 = vand.u32 4294901760, %v267_v3  ;;  %v280_v52 = vand.u32 4294901760, %v279_v0 }
  0x31   :  { %v286_v1 = vand.u32 4294901760, %v285_v26  ;;  %v2647_v46 = vand.u32 4294901760, %v91_v36  ;;  %1912 = vmatmul.mubr.f32.gmra.mrb[6].mxu1 %v1049_v30  ;;  %1918 = vmatprep.subr.mxu1 %v1074_v56  ;;  %v290_v38 = vand.u32 4294901760, %v2491_v62  ;;  %v296_v42 = vand.u32 4294901760, %v2508_v16  ;;  %p2196_p4 = pnand %p2195_p3, %p2189_p0 }
  0x32   :  { %v197_v49 = vsub.f32 %v2630_v45, %v196_v54  ;;  %1919 = vmatpush3.msra.mxu1 %v1074_v56  ;;  %1920 = vmatprep.mubr.f32.mxu1 %v2265_v11  ;;  %v2024_v57 = vpack.c.bf16 %v280_v52, %v268_v9  ;;  %v2084_v56 = vpack.c.bf16 %v2316_v29, %v2294_v21 }
  0x33   :  { %v2026_v33 = vpack.c.bf16 %v286_v1, %v274_v39  ;;  %v2656_v19 = vsub.f32 %v91_v36, %v2647_v46  ;;  %v291_v30 = vsub.f32 %v2491_v62, %v290_v38  ;;  %v297_v0 = vsub.f32 %v2508_v16, %v296_v42 }
  0x34   :  { %v198_v3 = vand.u32 4294901760, %v197_v49  ;;  %2025 = vmatprep.subr.bf16.mxu0 %v2024_v57  ;;  %v2028_v39 = vpack.c.bf16 %v2308_v27, %v2292_v20  ;;  %2085 = vmatprep.subr.bf16.mxu1 %v2084_v56  ;;  %v2030_v49 = vpack.c.bf16 %v2331_v34, %v2303_v25  ;;  %v2032_v57 = vpack.c.bf16 %v2367_v43, %v2359_v41 }
  0x35   :  { %v207_v26 = vand.u32 4294901760, %v2656_v19  ;;  %1921 = vmatmul.mubr.f32.vlgmr.msra.gmra.mrb[0].mxu1 %v2396_v53  ;;  %v292_v1 = vand.u32 4294901760, %v291_v30  ;;  %2027 = vmatpush1.bf16.msra.mxu0 %v2026_v33  ;;  %v298_v52 = vand.u32 4294901760, %v297_v0  ;;  %v2034_v33 = vpack.c.bf16 %v2386_v51, %v2384_v50 }
  0x36   :  { %199 = vmatmul.mubr.f32.gmra.mrb[4].mxu0 %v198_v3  ;;  %1923 = vmatprep.mubr.f32.mxu1 %v2404_v59  ;;  %v2036_v3 = vpack.c.bf16 %v2429_v8, %v2427_v7  ;;  %v2971_v30 = vmov 1.0|1.0   ;;  %v2038_v0 = vpack.c.bf16 %v2458_v24, %v2456_v22 }
  0x37   :  { %204 = vmatprep.mubr.f32.mxu0 %v2966_v55  ;;  %v208_v9 = vsub.f32 %v2656_v19, %v207_v26  ;;  %293 = vmatprep.subr.mxu0 %v292_v1  ;;  %v2974_v1 = vand.u32 4294901760, %v2316_v29 }
  0x38   :  { %2087 = vmatpush3.bf16.msra.mxu1 %v2084_v56  ;;  %v2973_v56 = vand.u32 4294901760, %v2294_v21  ;;  %v2975_v21 = vand.u32 4294901760, %v2376_v47 }
  0x39   :  { %v209_v36 = vand.u32 4294901760, %v208_v9  ;;  %1924 = vmatmul.mubr.f32.gmra.mrb[2].mxu1 %v2451_v18  ;;  %299 = vmatpush1.msra.mxu0 %v298_v52 }
  0x3a   :  { %1926 = vmatprep.mubr.f32.mxu1 %v2501_v2  ;;  %2029 = vmatprep.subr.bf16.mxu0 %v2028_v39  ;;  %v2092_v9 = vpack.c.bf16 %v2974_v1, %v2973_v56  ;;  %v2979_v39 = vand.u32 4294901760, %v2448_v17  ;;  %v2987_v56 = vand.u32 4294901760, %v2512_v44 }
  0x3b   :  { %210 = vmatmul.mubr.f32.gmra.mrb[6].mxu0 %v209_v36  ;;  %1936 = vmatprep.subr.mxu1 %v2607_v5  ;;  %v2978_v36 = vand.u32 4294901760, %v2411_v61 }
  0x3c   :  { %350 = vmatprep.mubr.f32.mxu0 %v2966_v55  ;;  %1937 = vmatpush3.msra.mxu1 %v2607_v5  ;;  %v2972_v5 = vmov 1.0  }
  0x3d   :  { %1927 = vmatmul.mubr.f32.gmra.mrb[4].mxu1 %v2525_v31  ;;  %2089 = vmatprep.subr.msk.bf16.mxu1 %vm2312_vm8, %v2971_v30 }
  0x3e   :  { %1929 = vmatprep.mubr.f32.mxu1 %v2558_v6 }
  0x3f   :  { %352 = vmatmul.mubr.f32.vlgmr.msra.gmra.mrb[0].mxu0 %v2503_v10 }
  0x40   :  { %2031 = vmatpush1.bf16.msra.mxu0 %v2030_v49  ;;  %357 = vmatprep.mubr.f32.mxu0 %v2966_v55 }
  0x41   :  { %2033 = vmatprep.subr.bf16.mxu0 %v2032_v57  ;;  %1930 = vmatmul.mubr.f32.gmra.mrb[6].mxu1 %v2589_v12 }
  0x42   :  { %1938 = vmatprep.mubr.f32.mxu1 %v2376_v47 }
  0x43   :  { %359 = vmatmul.mubr.f32.gmra.mrb[2].mxu0 %v2570_v48 }
  0x44   :  { %2035 = vmatpush1.bf16.msra.mxu0 %v2034_v33  ;;  %364 = vmatprep.mubr.f32.mxu0 %v2966_v55  ;;  %v2983_v33 = vand.u32 4294901760, %v2292_v20  ;;  %v2989_v20 = vand.u32 4294901760, %v2303_v25  ;;  %v2994_v25 = vand.u32 4294901760, %v2515_v14 }
  0x45   :  { %2037 = vmatprep.subr.bf16.mxu0 %v2036_v3  ;;  %1939 = vmatmul.mubr.f32.vlgmr.msra.gmra.mrb[0].mxu1 %v2411_v61  ;;  %v2984_v61 = vand.u32 4294901760, %v2308_v27  ;;  %v2990_v27 = vand.u32 4294901760, %v2331_v34  ;;  %v2995_v34 = vand.u32 4294901760, %v2568_v58 }
  0x46   :  { %1941 = vmatprep.mubr.f32.mxu1 %v2448_v17  ;;  %2091 = vmatpush3.bf16.msk.msra.mxu1 %vm2312_vm8, %v2971_v30  ;;  %v2985_v17 = vand.u32 4294901760, %v2466_v13 }
  0x47   :  { %366 = vmatmul.mubr.f32.gmra.mrb[4].mxu0 %v2617_v63  ;;  %1954 = vmatprep.subr.msk.mxu1 %vm2334_vm11, %v2972_v5  ;;  %v2052_v3 = vpack.c.bf16 %v2984_v61, %v2983_v33 }
  0x48   :  { %2039 = vmatpush1.bf16.msra.mxu0 %v2038_v0  ;;  %371 = vmatprep.mubr.f32.mxu0 %v2966_v55  ;;  %v2986_v0 = vld [vmem:[#allocation11_spill] sm:$0xff] }
  0x49   :  { %417 = vmatprep.subr.mxu0 %v2491_v62  ;;  %1942 = vmatmul.mubr.f32.gmra.mrb[2].mxu1 %v2466_v13  ;;  %v2054_v13 = vpack.c.bf16 %v2990_v27, %v2989_v20 }
  0x4a   :  { %1944 = vmatprep.mubr.f32.mxu1 %v2512_v44  ;;  %1955 = vmatpush3.msk.msra.mxu1 %vm2334_vm11, %v2972_v5  ;;  %v2993_v44 = vand.u32 4294901760, %v2541_v37 }
  0x4b   :  { %373 = vmatmul.mubr.f32.gmra.mrb[6].mxu0 %v2647_v46  ;;  %2093 = vmatprep.subr.bf16.mxu1 %v2092_v9 }
  0x4c   :  { %420 = vmatpush1.msra.mxu0 %v2508_v16  ;;  %471 = vmatprep.mubr.f32.mxu0 %v2966_v55 }
  0x4d   :  { %2041 = vmatprep.subr.msk.bf16.mxu0 %vm2297_vm6, %v2971_v30  ;;  %1945 = vmatmul.mubr.f32.gmra.mrb[4].mxu1 %v2541_v37  ;;  %v2998_v37 = vand.u32 4294901760, %v2427_v7 }
  0x4e   :  { %1947 = vmatprep.mubr.f32.mxu1 %v2568_v58  ;;  %v3000_v58 = vand.u32 4294901760, %v2581_v60 }
  0x4f   :  { %474 = vmatmul.mubr.f32.vlgmr.msra.gmra.mrb[0].mxu0 %v2515_v14  ;;  %v2060_v33 = vpack.c.bf16 %v278_v15, %v2998_v37  ;;  %v2999_v14 = vand.u32 4294901760, %v2605_v4 }
  0x50   :  { %2043 = vmatpush1.bf16.msk.msra.mxu0 %vm2326_vm9, %v2971_v30  ;;  %479 = vmatprep.mubr.f32.mxu0 %v2966_v55 }
  0x51   :  { %2045 = vmatprep.subr.msk.bf16.mxu0 %vm2355_vm1, %v2971_v30  ;;  %1948 = vmatmul.mubr.f32.gmra.mrb[6].mxu1 %v2605_v4 }
  0x52   :  { %1956 = vmatprep.mubr.f32.mxu1 %v2975_v21  ;;  %v2992_v21 = vand.u32 4294901760, %v2367_v43  ;;  %v2997_v43 = vand.u32 4294901760, %v2386_v51  ;;  %v3002_v51 = vand.u32 4294901760, %v2458_v24 }
  0x53   :  { %482 = vmatmul.mubr.f32.gmra.mrb[2].mxu0 %v2581_v60 }
  0x54   :  { %2047 = vmatpush1.bf16.msk.msra.mxu0 %vm2371_vm2, %v2971_v30  ;;  %487 = vmatprep.mubr.f32.mxu0 %v2966_v55 }
  0x55   :  { %2049 = vmatprep.subr.msk.bf16.mxu0 %vm2417_vm5, %v2971_v30  ;;  %1957 = vmatmul.mubr.f32.vlgmr.msra.gmra.mrb[0].mxu1 %v2978_v36 }
  0x56   :  { %1959 = vmatprep.mubr.f32.mxu1 %v2979_v39  ;;  %2095 = vmatpush3.bf16.msra.mxu1 %v2092_v9  ;;  %v2991_v9 = vand.u32 4294901760, %v2359_v41  ;;  %v2996_v41 = vand.u32 4294901760, %v2384_v50  ;;  %v3001_v50 = vand.u32 4294901760, %v2456_v22 }
  0x57   :  { %490 = vmatmul.mubr.f32.gmra.mrb[4].mxu0 %v2630_v45  ;;  %1972 = vmatprep.subr.mxu1 %v2986_v0 }
  0x58   :  { %2051 = vmatpush1.bf16.msk.msra.mxu0 %vm2431_vm12, %v2971_v30  ;;  %495 = vmatprep.mubr.f32.mxu0 %v2966_v55  ;;  %v2056_v36 = vpack.c.bf16 %v2992_v21, %v2991_v9  ;;  %v2058_v39 = vpack.c.bf16 %v2997_v43, %v2996_v41  ;;  %v2062_v61 = vpack.c.bf16 %v3002_v51, %v3001_v50 }
  0x59   :  { %1801 = vmatprep.subr.msk.mxu0 %vm47_vm13, %v2972_v5  ;;  %1960 = vmatmul.mubr.f32.gmra.mrb[2].mxu1 %v2985_v17 }
  0x5a   :  { %1962 = vmatprep.mubr.f32.mxu1 %v2987_v56  ;;  %1973 = vmatpush3.msra.mxu1 %v2986_v0 }
  0x5b   :  { %498 = vmatmul.mubr.f32.gmra.mrb[6].mxu0 %v2656_v19  ;;  %2097 = vmatprep.subr.msk.bf16.mxu1 %vm2312_vm8, %v2971_v30 }
  0x5c   :  { %1802 = vmatpush1.msk.msra.mxu0 %vm46_vm14, %v2972_v5  ;;  %582 = vmatprep.mubr.f32.mxu0 %v2966_v55 }
  0x5d   :  { %2053 = vmatprep.subr.bf16.mxu0 %v2052_v3  ;;  %1963 = vmatmul.mubr.f32.gmra.mrb[4].mxu1 %v2993_v44 }
  0x5e   :  { %1965 = vmatprep.mubr.f32.mxu1 %v2995_v34 }
  0x5f   :  { %586 = vmatmul.mubr.f32.vlgmr.msra.gmra.mrb[0].mxu0 %v2994_v25 }
  0x60   :  { %2055 = vmatpush1.bf16.msra.mxu0 %v2054_v13  ;;  %591 = vmatprep.mubr.f32.mxu0 %v2966_v55 }
  0x61   :  { %2057 = vmatprep.subr.bf16.mxu0 %v2056_v36  ;;  %1966 = vmatmul.mubr.f32.gmra.mrb[6].mxu1 %v2999_v14 }
  0x62   :  { %1974 = vmatprep.mubr.f32.mxu1 %v2265_v11 }
  0x63   :  { %595 = vmatmul.mubr.f32.gmra.mrb[2].mxu0 %v3000_v58 }
  0x64   :  { %2059 = vmatpush1.bf16.msra.mxu0 %v2058_v39  ;;  %600 = vmatprep.mubr.f32.mxu0 %v2966_v55 }
  0x65   :  { %2061 = vmatprep.subr.bf16.mxu0 %v2060_v33  ;;  %1975 = vmatmul.mubr.f32.vlgmr.msra.gmra.mrb[0].mxu1 %v2396_v53 }
  0x66   :  { %1977 = vmatprep.mubr.f32.mxu1 %v2404_v59  ;;  %2099 = vmatpush3.bf16.msk.msra.mxu1 %vm2312_vm8, %v2971_v30 }
  0x67   :  { %604 = vmatmul.mubr.f32.gmra.mrb[4].mxu0 %v196_v54  ;;  %1990 = vmatprep.subr.msk.mxu1 %vm2334_vm11, %v2972_v5 }
  0x68   :  { %2063 = vmatpush1.bf16.msra.mxu0 %v2062_v61  ;;  %609 = vmatprep.mubr.f32.mxu0 %v2966_v55 }
  0x69   :  { %670 = vmatprep.subr.mxu0 %v290_v38  ;;  %1978 = vmatmul.mubr.f32.gmra.mrb[2].mxu1 %v2451_v18 }
  0x6a   :  { %1980 = vmatprep.mubr.f32.mxu1 %v2501_v2  ;;  %1991 = vmatpush3.msk.msra.mxu1 %vm2334_vm11, %v2972_v5 }
  0x6b   :  { %613 = vmatmul.mubr.f32.gmra.mrb[6].mxu0 %v207_v26 }
  0x6c   :  { %674 = vmatpush1.msra.mxu0 %v296_v42  ;;  %725 = vmatprep.mubr.f32.mxu0 %v2966_v55 }
  0x6d   :  { %2065 = vmatprep.subr.msk.bf16.mxu0 %vm2297_vm6, %v2971_v30  ;;  %1981 = vmatmul.mubr.f32.gmra.mrb[4].mxu1 %v2525_v31 }
  0x6e   :  { %1983 = vmatprep.mubr.f32.mxu1 %v2558_v6 }
  0x6f   :  { %727 = vmatmul.mubr.f32.vlgmr.msra.gmra.mrb[0].mxu0 %v2503_v10 }
  0x70   :  { %2067 = vmatpush1.bf16.msk.msra.mxu0 %vm2326_vm9, %v2971_v30  ;;  %732 = vmatprep.mubr.f32.mxu0 %v2966_v55 }
  0x71   :  { %2069 = vmatprep.subr.msk.bf16.mxu0 %vm2355_vm1, %v2971_v30  ;;  %1984 = vmatmul.mubr.f32.gmra.mrb[6].mxu1 %v2589_v12 }
  0x72   :  { %1992 = vmatprep.mubr.f32.mxu1 %v2265_v11 }
  0x73   :  { %734 = vmatmul.mubr.f32.gmra.mrb[2].mxu0 %v2570_v48 }
  0x74   :  { %2071 = vmatpush1.bf16.msk.msra.mxu0 %vm2371_vm2, %v2971_v30  ;;  %739 = vmatprep.mubr.f32.mxu0 %v2966_v55 }
  0x75   :  { %2073 = vmatprep.subr.msk.bf16.mxu0 %vm2417_vm5, %v2971_v30  ;;  %1993 = vmatmul.mubr.f32.vlgmr.msra.gmra.mrb[0].mxu1 %v2396_v53 }
  0x76   :  { %1995 = vmatprep.mubr.f32.mxu1 %v2404_v59 }
  0x77   :  { %741 = vmatmul.mubr.f32.gmra.mrb[4].mxu0 %v2617_v63 }
  0x78   :  { %2075 = vmatpush1.bf16.msk.msra.mxu0 %vm2431_vm12, %v2971_v30  ;;  %746 = vmatprep.mubr.f32.mxu0 %v2966_v55 }
  0x79   :  { %1815 = vmatprep.subr.msk.mxu0 %vm47_vm13, %v2972_v5  ;;  %1996 = vmatmul.mubr.f32.gmra.mrb[2].mxu1 %v2451_v18 }
  0x7a   :  { %1998 = vmatprep.mubr.f32.mxu1 %v2501_v2 }
  0x7b   :  { %748 = vmatmul.mubr.f32.gmra.mrb[6].mxu0 %v2647_v46 }
  0x7c   :  { %1816 = vmatpush1.msk.msra.mxu0 %vm46_vm14, %v2972_v5  ;;  %832 = vmatprep.mubr.f32.mxu0 %v2966_v55 }
  0x7d   :  { %1999 = vmatmul.mubr.f32.gmra.mrb[4].mxu1 %v2525_v31 }
  0x7e   :  { %2001 = vmatprep.mubr.f32.mxu1 %v2558_v6 }
  0x7f   :  { %834 = vmatmul.mubr.f32.vlgmr.msra.gmra.mrb[0].mxu0 %v2503_v10 }
  0x80   :  { %839 = vmatprep.mubr.f32.mxu0 %v2966_v55 }
  0x81   :  { %2002 = vmatmul.mubr.f32.gmra.mrb[6].mxu1 %v2589_v12 }
  0x83   :  { %841 = vmatmul.mubr.f32.gmra.mrb[2].mxu0 %v2570_v48 }
  0x84   :  { %846 = vmatprep.mubr.f32.mxu0 %v2966_v55 }
  0x87   :  { %848 = vmatmul.mubr.f32.gmra.mrb[4].mxu0 %v2617_v63 }
  0x88   :  { %853 = vmatprep.mubr.f32.mxu0 %v2966_v55 }
  0x8b   :  { %855 = vmatmul.mubr.f32.gmra.mrb[6].mxu0 %v2647_v46 }
 0x148   :  { %v1994_v11 = vpop.f32.mrb[0].mxu1 }
 0x149   :  { %v1634_v23 = vpop.f32.mrb[1].mxu1 }
 0x14c   :  { %v1997_v28 = vpop.f32.mrb[2].mxu1 }
 0x14d   :  { %v1646_v32 = vpop.f32.mrb[3].mxu1 }
 0x150   :  { %v2000_v35 = vpop.f32.mrb[4].mxu1 }
 0x151   :  { %v1658_v53 = vpop.f32.mrb[5].mxu1 }
 0x152   :  { %v835_v40 = vpop.f32.mrb[0].mxu0 }
 0x153   :  { %v837_v59 = vpop.f32.mrb[1].mxu0  ;;  %v1680_v22 = vmul.f32 %v835_v40, %v835_v40 }
 0x154   :  { %v2003_v7 = vpop.f32.mrb[6].mxu1  ;;  %v1695_v62 = vmul.f32 %v837_v59, %v837_v59 }
 0x155   :  { %v1670_v18 = vpop.f32.mrb[7].mxu1 }
 0x156   :  { %v842_v8 = vpop.f32.mrb[2].mxu0 }
 0x157   :  { %v1681_v24 = vmul.f32 %v842_v8, %v842_v8  ;;  %v844_v31 = vpop.f32.mrb[3].mxu0 }
 0x158   :  { %v1696_v2 = vmul.f32 %v844_v31, %v844_v31 }
 0x159   :  { %v1684_v10 = vadd.f32 %v1681_v24, %v1680_v22 }
 0x15a   :  { %v1699_v16 = vadd.f32 %v1696_v2, %v1695_v62  ;;  %v849_v48 = vpop.f32.mrb[4].mxu0 }
 0x15b   :  { %v1682_v46 = vmul.f32 %v849_v48, %v849_v48  ;;  %v851_v6 = vpop.f32.mrb[5].mxu0 }
 0x15c   :  { %v1697_v55 = vmul.f32 %v851_v6, %v851_v6 }
 0x15d   :  { %v1685_v60 = vadd.f32 %v1684_v10, %v1682_v46 }
 0x15e   :  { %v1700_v12 = vadd.f32 %v1699_v16, %v1697_v55  ;;  %v856_v4 = vpop.f32.mrb[6].mxu0 }
 0x15f   :  { %v1683_v63 = vmul.f32 %v856_v4, %v856_v4  ;;  %v858_v15 = vpop.f32.mrb[7].mxu0 }
 0x160   :  { %v1698_v45 = vmul.f32 %v858_v15, %v858_v15 }
 0x161   :  { %v1686_v54 = vadd.f32 %v1685_v60, %v1683_v63 }
 0x162   :  { %v1701_v38 = vadd.f32 %v1700_v12, %v1698_v45 }
 0x163   :  { %v1687_v42 = vrot.slane %v1686_v54, 4 }
 0x164   :  { %v1702_v19 = vrot.slane %v1701_v38, 4 }
 0x165   :  { %v1688_v26 = vadd.f32 %v1687_v42, %v1686_v54 }
 0x166   :  { %v1703_v30 = vadd.f32 %v1702_v19, %v1701_v38 }
 0x167   :  { %v1689_v5 = vrot.slane %v1688_v26, 2 }
 0x168   :  { %v1704_v29 = vrot.slane %v1703_v30, 2 }
 0x169   :  { %v1690_v52 = vadd.f32 %v1689_v5, %v1688_v26 }
 0x16a   :  { %v1705_v47 = vadd.f32 %v1704_v29, %v1703_v30 }
 0x16b   :  { %v1691_v49 = vrot.slane %v1690_v52, 1 }
 0x16c   :  { %v1706_v57 = vrot.slane %v1705_v47, 1 }
 0x16d   :  { %v1692_v3 = vadd.f32 %v1691_v49, %v1690_v52 }
 0x16e   :  { %v1707_v17 = vadd.f32 %v1706_v57, %v1705_v47 }
 0x16f   :  { %v1693_v0 = vmax.f32 %v1692_v3, 1e-24 }
 0x170   :  { %v1708_v56 = vmax.f32 %v1707_v17, 1e-24 }
 0x171   :  { %2184 = vrsqrt.f32 %v1693_v0 }
 0x172   :  { %2186 = vrsqrt.f32 %v1708_v56 }
 0x17b   :  { %v2185_v1 = vpop.eup %2184 }
 0x17c   :  { %v2187_v20 = vpop.eup %2186  ;;  %v1713_v27 = vmul.f32 %v2185_v1, %v856_v4  ;;  %v1710_v13 = vmul.f32 %v2185_v1, %v835_v40  ;;  %v1711_v9 = vmul.f32 %v2185_v1, %v842_v8  ;;  %v1712_v21 = vmul.f32 %v2185_v1, %v849_v48 }
 0x17d   :  { %v1718_v36 = vmul.f32 %v2187_v20, %v837_v59  ;;  %v1719_v44 = vmul.f32 %v2187_v20, %v844_v31  ;;  %v1720_v25 = vmul.f32 %v2187_v20, %v851_v6  ;;  %v1721_v34 = vmul.f32 %v2187_v20, %v858_v15 }
 0x17e   :  { %v1717_v41 = vmul.f32 %v1997_v28, %v1713_v27  ;;  %v1714_v43 = vmul.f32 %v1710_v13, %v1634_v23  ;;  %v1715_v39 = vmul.f32 %v1994_v11, %v1711_v9  ;;  %v1716_v37 = vmul.f32 %v1712_v21, %v1646_v32 }
 0x17f   :  { %v1722_v33 = vmul.f32 %v1718_v36, %v1658_v53  ;;  %v1723_v14 = vmul.f32 %v2000_v35, %v1719_v44  ;;  %v1724_v58 = vmul.f32 %v1720_v25, %v1670_v18  ;;  %v1725_v50 = vmul.f32 %v2003_v7, %v1721_v34 }
 0x181   :  { %v1726_v51 = vsub.f32 %v1714_v43, %v1722_v33  ;;  %v1727_v61 = vsub.f32 %v1715_v39, %v1723_v14  ;;  %v1728_v22 = vsub.f32 %v1716_v37, %v1724_v58  ;;  %v1729_v24 = vsub.f32 %v1717_v41, %v1725_v50 }
 0x183   :  { %v1730_v62 = vand.u32 2147483647, %v1726_v51  ;;  %v1731_v40 = vand.u32 2147483647, %v1727_v61  ;;  %v1732_v8 = vand.u32 2147483647, %v1728_v22 }
 0x184   :  { %v1733_v59 = vand.u32 2147483647, %v1729_v24 }
 0x185   :  { %v1734_v2 = vadd.f32 %v1731_v40, %v1730_v62 }
 0x187   :  { %v1735_v31 = vadd.f32 %v1734_v2, %v1732_v8 }
 0x189   :  { %v1736_v10 = vadd.f32 %v1735_v31, %v1733_v59 }
 0x18b   :  { %v1737_v16 = vrot.slane %v1736_v10, 4 }
 0x18d   :  { %v1738_v28 = vadd.f32 %v1737_v16, %v1736_v10 }
 0x18f   :  { %v1739_v23 = vrot.slane %v1738_v28, 2 }
 0x191   :  { %v1740_v11 = vadd.f32 %v1739_v23, %v1738_v28 }
 0x193   :  { %v1741_v32 = vrot.slane %v1740_v11, 1 }
 0x195   :  { %v1742_v35 = vadd.f32 %v1741_v32, %v1740_v11 }
 0x197   :  { %v1743_v53 = vsub.f32 6.0, %v1742_v35 }
 0x199   :  { %1744 = vst [vmem:[#allocation2] sm:$0x1] %v1743_v53 }
 0x19a   :  { %2199 = shalt.err (!%p2196_p4)
}
 0x19b   :  { %s2200_s18 = scalar_lea.hbm %s2903_s3, 16 }
 0x19c   :  { %p2201_p5 = scmp.ne.s32.totalorder %s2903_s3, %s2200_s18  ;;  %p2204_p6 = scmp.lt.u32.totalorder %s2200_s18, %s2903_s3 }
 0x19e   :  { %p2206_p7 = pnand %p2204_p6, %p2201_p5 }
 0x1a0   :  { %2209 = shalt.err (!%p2206_p7)
}
 0x1a1   :  { %1754 = dma.vmem_to_hbm [thread:$0]  %s1752_s13, 16, %s2903_s3, [#allocation3]  }
 0x1a2   :  { %2210 = dma.done.wait [#allocation3], 16  }
 0x1a3   :  { %2211 = vsyncadd [#allocation3], 4294967280 }
 0x1a4   :  { %1758 = vsyncpa [#allocation3], 1 }

</bundles_post_ra>
